<compile_context>
chip_gen: v5e
topology: v5e:2x2
jax: 0.10.0
libtpu: 0.0.40
codegen_flags: <defaults>
</compile_context>

<pallas_src>
import functools

import jax
import jax.numpy as jnp
from jax.experimental import pallas as pl
from jax.experimental.pallas import tpu as pltpu


def _round_up(x, m):
    return (x + m - 1) // m * m


@functools.lru_cache(maxsize=None)
def _vmem_limit_bytes():
    """Per-generation scoped-VMEM limit (v7x has 64 MiB/TC; v4/v5/v6 128 MiB)."""
    try:
        kind = jax.devices()[0].device_kind.lower()
    except Exception:
        kind = ""
    if "v7" in kind or "7x" in kind:
        return 48 * 1024 * 1024
    if any(g in kind for g in ("v4", "v5", "v6")):
        return 96 * 1024 * 1024
    return 16 * 1024 * 1024          # unknown / older generations: conservative


def _pick_batch_tile(batch):
    """LSTM batch-chunk: a multiple-of-8 divisor of B, preferring >=2 chunks so
    v7x's two TensorCores can split the serial recurrence."""
    if batch < 16 or batch % 8 != 0:
        return batch
    target = min(64, (batch // 2) // 8 * 8)
    for c in range(target, 7, -8):
        if batch % c == 0:
            return c
    return batch


def _attention_batch_tile(batch, ctx_row_bytes, vmem_limit):
    """Rows per attention block: half the scoped VMEM limit is reserved for the
    double-buffered (TB, V, F) f32 feature stream."""
    budget_rows = max(8, (vmem_limit // 2) // ctx_row_bytes)
    cap = min(budget_rows, 256)
    if batch <= cap or batch % 8 != 0:
        return batch
    cap = cap // 8 * 8
    for c in range(cap, 7, -8):
        if batch % c == 0:
            return c
    return batch


def _pick_f_chunk(f, target=512):
    """Largest 128-aligned divisor of F that is <= target (F itself if small)."""
    if f <= target:
        return f
    for c in range(target - target % 128, 127, -128):
        if f % c == 0:
            return c
    return f


# ----------------------------------------------------------------------------
# Hoisted input projection: preact = X @ W_ih + (b_ih + b_hh), all timesteps at
# once.  M-tiled, megacore-parallel; weight/bias single-buffered; the bf16 cast
# happens per-tile in VMEM (no wrapper-side cast pass).
# ----------------------------------------------------------------------------
def _proj_kernel(x_ref, w_ref, b_ref, out_ref):
    out_ref[...] = (
        jnp.dot(x_ref[...].astype(jnp.bfloat16), w_ref[...],
                preferred_element_type=jnp.float32)
        + b_ref[...]
    ).astype(out_ref.dtype)


def input_projection(x, w, b, *, tile_m=512):
    """x: (M, D) f32, w: (D, G) bf16, b: (1, G) f32. Returns (M, G) f32."""
    M, D = x.shape
    G = w.shape[1]
    vmem_limit = _vmem_limit_bytes()
    # double-buffered in/out tiles + resident bf16 weight within the budget
    bytes_per_row = 2 * D * 4 + 2 * G * 4
    w_bytes = int(w.size) * w.dtype.itemsize
    tm_budget = max(8, (vmem_limit - w_bytes - (2 << 20)) // bytes_per_row)
    TM = int(min(tile_m, tm_budget, _round_up(M, 8)))
    TM = max(8, TM // 8 * 8)
    M_pad = _round_up(M, TM)
    if M_pad != M:
        x = jnp.pad(x, ((0, M_pad - M), (0, 0)))
    out = pl.pallas_call(
        _proj_kernel,
        out_shape=jax.ShapeDtypeStruct((M_pad, G), jnp.float32),
        grid_spec=pltpu.PrefetchScalarGridSpec(
            num_scalar_prefetch=0,
            grid=(M_pad // TM,),
            in_specs=[
                pl.BlockSpec((TM, D), lambda i: (i, 0)),
                pl.BlockSpec((D, G), lambda i: (0, 0),
                             pipeline_mode=pl.Buffered(1)),
                pl.BlockSpec((1, G), lambda i: (0, 0),
                             pipeline_mode=pl.Buffered(1)),
            ],
            out_specs=pl.BlockSpec((TM, G), lambda i: (i, 0)),
        ),
        compiler_params=pltpu.CompilerParams(
            dimension_semantics=("parallel",),
            vmem_limit_bytes=vmem_limit),
    )(x, w, b)
    return out[:M]


# ----------------------------------------------------------------------------
# LSTM recurrence kernel: grid = (batch-chunks [parallel], time-chunks
# [arbitrary]).  Each grid step runs TL timesteps from VMEM with a short static
# loop; h/c persist in VMEM scratch across time chunks.  Per step only
# gates = preact_t + h_{t-1} @ W_hh  plus the elementwise gates (PyTorch i,f,g,o).
# ----------------------------------------------------------------------------
def _lstm_kernel(preact_ref, whh_ref, out_ref, h_scr, c_scr):
    @pl.when(pl.program_id(1) == 0)
    def _():
        h_scr[...] = jnp.zeros_like(h_scr)
        c_scr[...] = jnp.zeros_like(c_scr)

    tl = preact_ref.shape[0]
    hid = whh_ref.shape[0]
    h = h_scr[...]                                         # (TB, H) f32
    c = c_scr[...]
    for s in range(tl):                                    # static time chunk
        gates = preact_ref[s] + jnp.dot(
            h.astype(jnp.bfloat16), whh_ref[...],
            preferred_element_type=jnp.float32)            # (TB, 4H) f32
        i_g = jax.nn.sigmoid(gates[:, 0 * hid:1 * hid])
        f_g = jax.nn.sigmoid(gates[:, 1 * hid:2 * hid])
        g_g = jnp.tanh(gates[:, 2 * hid:3 * hid])
        o_g = jax.nn.sigmoid(gates[:, 3 * hid:4 * hid])
        c = f_g * c + i_g * g_g
        h = o_g * jnp.tanh(c)
        out_ref[s] = h.astype(out_ref.dtype)
    h_scr[...] = h
    c_scr[...] = c


def lstm_recurrence(preact_tm, whh):
    """preact_tm: (L_pad, B, 4H) f32 time-major preactivations (x@Wih + b
    already applied). whh: (H, 4H) bf16. Returns hidden states (L_pad, B, H)."""
    L_pad, B, G = preact_tm.shape
    H = whh.shape[0]
    TL = L_pad if L_pad <= 16 else 16        # L_pad is a multiple of 16 when > 16
    TB = _pick_batch_tile(B)
    return pl.pallas_call(
        _lstm_kernel,
        out_shape=jax.ShapeDtypeStruct((L_pad, B, H), jnp.float32),
        grid_spec=pltpu.PrefetchScalarGridSpec(
            num_scalar_prefetch=0,
            grid=(B // TB, L_pad // TL),
            in_specs=[
                pl.BlockSpec((TL, TB, G), lambda bi, ti: (ti, bi, 0)),
                pl.BlockSpec((H, G), lambda bi, ti: (0, 0),
                             pipeline_mode=pl.Buffered(1)),   # loop-invariant
            ],
            out_specs=pl.BlockSpec((TL, TB, H), lambda bi, ti: (ti, bi, 0)),
            scratch_shapes=[
                pltpu.VMEM((TB, H), jnp.float32),   # h state
                pltpu.VMEM((TB, H), jnp.float32),   # c state
            ],
        ),
        compiler_params=pltpu.CompilerParams(
            dimension_semantics=("parallel", "arbitrary"),
            vmem_limit_bytes=_vmem_limit_bytes()),
    )(preact_tm, whh)


# ----------------------------------------------------------------------------
# SoftDotAttention, 2-D grid over (timestep, batch-chunk).  Hidden states are
# read time-major, the feature tensor batch-major (both directly via
# BlockSpecs, no transposes, no bf16 pre-cast).  Per block:
#   target   = h @ W_in^T                                (TB, F)
#   logits   = sum_f feat * target    (chunked over F)   (TB, V)
#   attn     = softmax(logits)                           (TB, V)
#   h_tilde  = tanh(weighted @ Wout[:F] + h @ Wout[F:])  (TB, H)
# with the weighted-context matmul accumulated per F-chunk.
# ----------------------------------------------------------------------------
def _make_attention_kernel(fc, n_chunks):
    def kernel(h_ref, feat_ref, w_in_ref, w_out_ctx_ref, w_out_h_ref, out_ref):
        h = h_ref[...]                                           # (TB, H) f32
        tb, v, _ = feat_ref.shape
        target = jnp.dot(h.astype(jnp.bfloat16), w_in_ref[...],
                         preferred_element_type=jnp.float32)     # (TB, F)

        # logits accumulated over static F chunks: no (TB, V, F) f32 temp.
        logits = jnp.zeros((tb, v), jnp.float32)
        for j in range(n_chunks):
            f_c = feat_ref[:, :, j * fc:(j + 1) * fc]            # (TB, V, FC)
            t_c = target[:, j * fc:(j + 1) * fc]
            logits = logits + jnp.sum(f_c * t_c[:, None, :], axis=-1)

        logits = logits - jnp.max(logits, axis=-1, keepdims=True)
        e = jnp.exp(logits)
        attn = e * pl.reciprocal(jnp.sum(e, axis=-1, keepdims=True),
                                 approx=True)                    # (TB, V)

        # h_tilde = tanh([weighted, h] @ W_out) with the concat split in two.
        pre = jnp.dot(h.astype(jnp.bfloat16), w_out_h_ref[...],
                      preferred_element_type=jnp.float32)        # (TB, H)
        for j in range(n_chunks):
            f_c = feat_ref[:, :, j * fc:(j + 1) * fc]
            w_c = jnp.sum(attn[:, :, None] * f_c, axis=1)        # (TB, FC)
            pre = pre + jnp.dot(w_c.astype(jnp.bfloat16),
                                w_out_ctx_ref[j * fc:(j + 1) * fc, :],
                                preferred_element_type=jnp.float32)
        out_ref[...] = jnp.tanh(pre).astype(out_ref.dtype)
    return kernel


def soft_dot_attention(ctx_tm, feature, w_in_t, w_out_ctx_t, w_out_h_t):
    """ctx_tm: (L, B, H) f32 time-major hidden states; feature: (B, L, V, F)
    f32 batch-major view features.  Returns h_tilde (L, B, H) f32."""
    L, B, H = ctx_tm.shape
    V, F = feature.shape[2], feature.shape[3]
    vmem_limit = _vmem_limit_bytes()
    ctx_row_bytes = 2 * V * F * feature.dtype.itemsize   # double-buffered stream
    TB = _attention_batch_tile(B, ctx_row_bytes, vmem_limit)
    fc = _pick_f_chunk(F)
    kernel = _make_attention_kernel(fc, F // fc)
    return pl.pallas_call(
        kernel,
        out_shape=jax.ShapeDtypeStruct((L, B, H), jnp.float32),
        grid_spec=pltpu.PrefetchScalarGridSpec(
            num_scalar_prefetch=0,
            grid=(L, B // TB),
            in_specs=[
                pl.BlockSpec((None, TB, H), lambda li, bi: (li, bi, 0)),
                pl.BlockSpec((TB, None, V, F), lambda li, bi: (bi, li, 0, 0)),
                pl.BlockSpec((H, F), lambda li, bi: (0, 0),
                             pipeline_mode=pl.Buffered(1)),
                pl.BlockSpec((F, H), lambda li, bi: (0, 0),
                             pipeline_mode=pl.Buffered(1)),
                pl.BlockSpec((H, H), lambda li, bi: (0, 0),
                             pipeline_mode=pl.Buffered(1)),
            ],
            out_specs=pl.BlockSpec((None, TB, H), lambda li, bi: (li, bi, 0)),
        ),
        compiler_params=pltpu.CompilerParams(
            dimension_semantics=("parallel", "parallel"),
            vmem_limit_bytes=vmem_limit),
    )(ctx_tm, feature, w_in_t, w_out_ctx_t, w_out_h_t)


# ----------------------------------------------------------------------------
# SpeakerEncoder parameters + forward wrapper
# ----------------------------------------------------------------------------
def init_speaker_encoder_params(key, feature_size, hidden_size):
    F, H = feature_size, hidden_size
    ks = jax.random.split(key, 9)
    scale = 0.1

    def nrm(k, shape, dtype):
        return (scale * jax.random.normal(k, shape)).astype(dtype)

    bf16 = jnp.bfloat16
    return {
        # lstm: input F -> hidden H (weights pre-transposed for x @ W; PyTorch
        # gate order i, f, g, o along the 4H axis), bf16 with f32 accumulation.
        "lstm_wih": nrm(ks[0], (F, 4 * H), bf16),
        "lstm_whh": nrm(ks[1], (H, 4 * H), bf16),
        "lstm_b":   nrm(ks[2], (1, 4 * H), jnp.float32),   # b_ih + b_hh combined
        # attention: linear_in (H -> F) bias-free; linear_out (F+H -> H)
        # bias-free, stored split [context-part | h-part] (== concat weight).
        "attn_w_in_t":      nrm(ks[3], (H, F), bf16),
        "attn_w_out_ctx_t": nrm(ks[4], (F, H), bf16),
        "attn_w_out_h_t":   nrm(ks[5], (H, H), bf16),
        # post_lstm: input H -> hidden H
        "post_wih": nrm(ks[6], (H, 4 * H), bf16),
        "post_whh": nrm(ks[7], (H, 4 * H), bf16),
        "post_b":   nrm(ks[8], (1, 4 * H), jnp.float32),
    }


def speaker_encoder_forward(params, action_embeds, feature, lengths=None,
                            already_dropfeat=True):
    """action_embeds: (B, L, F), feature: (B, L, V, F). Returns (B, L, H)."""
    del lengths  # not used, matching the PyTorch module
    # TODO(synk): training-mode dropout (drop / drop3 / featdropout when
    # already_dropfeat=False) is not implemented; eval-mode semantics only.
    B, L, F = action_embeds.shape
    H = params["lstm_whh"].shape[0]
    L_pad = L if L <= 16 else _round_up(L, 16)   # pad time to a whole chunk

    # --- first LSTM: hoisted input projection + time-chunked recurrence ---
    x_tm = jnp.transpose(action_embeds, (1, 0, 2))               # (L, B, F)
    if L_pad != L:
        x_tm = jnp.pad(x_tm, ((0, L_pad - L), (0, 0), (0, 0)))
    preact1 = input_projection(x_tm.reshape(L_pad * B, F),
                               params["lstm_wih"], params["lstm_b"])
    ctx_tm = lstm_recurrence(preact1.reshape(L_pad, B, 4 * H),
                             params["lstm_whh"])[:L]             # (L, B, H)

    # --- soft-dot attention: ctx read time-major, feature batch-major, both
    #     straight from HBM via BlockSpecs (no transpose, no bf16 pre-cast) ---
    h_tilde_tm = soft_dot_attention(ctx_tm, feature,
                                    params["attn_w_in_t"],
                                    params["attn_w_out_ctx_t"],
                                    params["attn_w_out_h_t"])    # (L, B, H)

    # --- post LSTM ---
    if L_pad != L:
        h_tilde_tm = jnp.pad(h_tilde_tm, ((0, L_pad - L), (0, 0), (0, 0)))
    preact2 = input_projection(h_tilde_tm.reshape(L_pad * B, H),
                               params["post_wih"], params["post_b"])
    out_tm = lstm_recurrence(preact2.reshape(L_pad, B, 4 * H),
                             params["post_whh"])[:L]             # (L, B, H)
    return jnp.transpose(out_tm, (1, 0, 2))                      # (B, L, H)


if __name__ == "__main__":
    # Small, lane/sublane-friendly demo shapes consistent with the module:
    #   action_embeds: (B, L, feature_size), feature: (B, L, V, feature_size)
    B, L, V = 8, 8, 8
    feature_size, hidden_size = 128, 128

    key = jax.random.PRNGKey(0)
    k_p, k_a, k_f = jax.random.split(key, 3)

    params = init_speaker_encoder_params(k_p, feature_size, hidden_size)
    action_embeds = jax.random.normal(
        k_a, (B, L, feature_size), dtype=jnp.float32)
    feature = jax.random.normal(
        k_f, (B, L, V, feature_size), dtype=jnp.float32)

    out = speaker_encoder_forward(params, action_embeds, feature,
                                  lengths=None, already_dropfeat=True)
    out = jax.block_until_ready(out)
    assert out.shape == (B, L, hidden_size)
    print("KERNEL_OK")
</pallas_src>

<mosaic_0001>
module attributes {stable_mosaic.version = 11 : i64} {
  func.func @_proj_kernel(%arg0: i32, %arg1: memref<64x128xf32, #tpu.memory_space<vmem>>, %arg2: memref<128x512xbf16, #tpu.memory_space<vmem>>, %arg3: memref<1x512xf32, #tpu.memory_space<vmem>>, %arg4: memref<64x512xf32, #tpu.memory_space<vmem>>) attributes {dimension_semantics = [#tpu.dimension_semantics<parallel>], iteration_bounds = array<i64: 1>, scalar_prefetch = 0 : i64, scratch_operands = 0 : i64, tpu.core_type = #tpu.core_type<tc>, window_params = [{transform_indices = @transform_0, window_bounds = array<i64: 64, 128>}, {pipeline_mode = #tpu.pipeline_mode<synchronous>, transform_indices = @transform_1, window_bounds = array<i64: 128, 512>}, {pipeline_mode = #tpu.pipeline_mode<synchronous>, transform_indices = @transform_2, window_bounds = array<i64: 1, 512>}, {transform_indices = @transform_3, window_bounds = array<i64: 64, 512>}]} {
    %c0 = arith.constant 0 : index
    %c0_0 = arith.constant 0 : index
    %0 = vector.load %arg1[%c0, %c0_0] : memref<64x128xf32, #tpu.memory_space<vmem>>, vector<64x128xf32>
    %1 = arith.truncf %0 : vector<64x128xf32> to vector<64x128xbf16>
    %c0_1 = arith.constant 0 : index
    %c0_2 = arith.constant 0 : index
    %2 = vector.load %arg2[%c0_1, %c0_2] : memref<128x512xbf16, #tpu.memory_space<vmem>>, vector<128x512xbf16>
    %cst = arith.constant dense<0.000000e+00> : vector<64x512xf32>
    %3 = tpu.matmul %1, %2, %cst {dimension_numbers = #tpu.dot_dimension_numbers<[1], [0], [0], [1], [0, 0, 1, 1], [], []>} : vector<64x128xbf16>, vector<128x512xbf16>, vector<64x512xf32> -> vector<64x512xf32>
    %c0_3 = arith.constant 0 : index
    %c0_4 = arith.constant 0 : index
    %4 = vector.load %arg3[%c0_3, %c0_4] : memref<1x512xf32, #tpu.memory_space<vmem>>, vector<1x512xf32>
    %5 = vector.broadcast %4 : vector<1x512xf32> to vector<64x512xf32>
    %6 = arith.addf %3, %5 : vector<64x512xf32>
    %c0_5 = arith.constant 0 : index
    %c0_6 = arith.constant 0 : index
    %7 = vector.load %arg4[%c0_5, %c0_6] : memref<64x512xf32, #tpu.memory_space<vmem>>, vector<64x512xf32>
    tpu.vector_store %arg4[%c0_5, %c0_6], %6 {strides = array<i32>} : memref<64x512xf32, #tpu.memory_space<vmem>>, vector<64x512xf32>,
    return
  }
  func.func @transform_0(%arg0: i32) -> (i32, i32) {
    %c0_i32 = arith.constant 0 : i32
    %c0_i32_0 = arith.constant 0 : i32
    return %arg0, %c0_i32 : i32, i32
  }
  func.func @transform_1(%arg0: i32) -> (i32, i32) {
    %c0_i32 = arith.constant 0 : i32
    %c0_i32_0 = arith.constant 0 : i32
    %c0_i32_1 = arith.constant 0 : i32
    return %c0_i32, %c0_i32_0 : i32, i32
  }
  func.func @transform_2(%arg0: i32) -> (i32, i32) {
    %c0_i32 = arith.constant 0 : i32
    %c0_i32_0 = arith.constant 0 : i32
    %c0_i32_1 = arith.constant 0 : i32
    return %c0_i32, %c0_i32_0 : i32, i32
  }
  func.func @transform_3(%arg0: i32) -> (i32, i32) {
    %c0_i32 = arith.constant 0 : i32
    %c0_i32_0 = arith.constant 0 : i32
    return %arg0, %c0_i32 : i32, i32
  }
}

</mosaic_0001>

<bundles_post_ra>
// kernel: tpu_custom_call.1
= control target key start
LH: loop header
LB: loop body
LE: loop exit
PB: predicated region body
PF: predicated region fallthrough
CT: control target
= control target key end

     0   :  { %8 = vsyncpa [#allocation3], 0  ;;  %s796_s0 = inlined_call_operand.hbm [shape: f32[64,128], index: 0, kind: input, shape index: {}]   ;;  %s797_s1 = inlined_call_operand.hbm [shape: bf16[128,512], index: 1, kind: input, shape index: {}]   ;;  %s798_s2 = inlined_call_operand.hbm [shape: f32[1,512], index: 2, kind: input, shape index: {}]   ;;  %s799_s3 = inlined_call_operand.hbm [shape: f32[64,512], index: 3, kind: output, shape index: {}]  }
   0x1   :  { %9 = vsyncpa [#allocation6], 0  ;;  %s28_s14 = sshll.u32 %s797_s1, 4  ;;  %s29_s14 = int_to_ptr.hbm [resolvable:$true] %s28_s14 }
   0x2   :  { %10 = vsyncpa [#allocation4], 0  ;;  %s714_s15 = smov [#allocation5]   ;;  %s15_s19 = sshll.u32 %s796_s0, 4  ;;  %s16_s19 = int_to_ptr.hbm [resolvable:$true] %s15_s19 }
   0x3   :  { %s30_s16 = sshll.u32 %s714_s15, 4  ;;  %s715_s20 = smov 256   ;;  %s31_s16 = int_to_ptr.vmem [resolvable:$true] %s30_s16 }
   0x4   :  { %s716_s21 = smov 16   ;;  %s717_s22 = smov [#allocation2]  }
   0x5   :  { %36 = dma.hbm_to_vmem [thread:$0]  %s29_s14, 4096, %s31_s16, [#allocation6], %s715_s20, %s715_s20, %s716_s21  }
   0x6   :  { %s17_s23 = sshll.u32 %s717_s22, 4  ;;  %s718_s24 = smov 128   ;;  %s18_s23 = int_to_ptr.vmem [resolvable:$true] %s17_s23 }
   0x7   :  { %s719_s25 = smov 8   ;;  %s42_s27 = sshll.u32 %s798_s2, 4  ;;  %s43_s27 = int_to_ptr.hbm [resolvable:$true] %s42_s27 }
   0x8   :  { %23 = dma.hbm_to_vmem [thread:$0]  %s16_s19, 1024, %s18_s23, [#allocation3], %s718_s24, %s718_s24, %s719_s25  }
   0x9   :  { %s720_s28 = smov [#allocation7]  }
   0xa   :  { %s44_s29 = sshll.u32 %s720_s28, 4  ;;  %s45_s29 = int_to_ptr.vmem [resolvable:$true] %s44_s29 }
   0xb   :  { %47 = dma.hbm_to_vmem [thread:$0]  %s43_s27, 64, %s45_s29, [#allocation6]  }
   0xc   :  { %708 = dma.done.wait [#allocation3], 1024  }
   0xd   :  { %709 = vsyncadd [#allocation3], 4294966272 }
   0xe   :  { %710 = dma.done.wait [#allocation6], 4160  }
   0xf   :  { %711 = vsyncadd [#allocation6], 4294963136  ;;  %v556_v0 = vld [vmem:[#allocation5 + $0xe0] sm:$0xf]  ;;  %v600_v1 = vld [vmem:[#allocation5 + $0xec] sm:$0xf0] }
  0x10   :  { %v598_v2 = vld [vmem:[#allocation5 + $0xe4] sm:$0xf]  ;;  %v557_v3 = vor.u32 %v600_v1, %v556_v0  ;;  %v558_v4 = vld [vmem:[#allocation5 + $0xf0] sm:$0xf0]  ;;  %v564_v5 = vld [vmem:[#allocation5 + $0xe8] sm:$0xf] }
  0x11   :  { %v601_v6 = vld [vmem:[#allocation5 + $0xf4] sm:$0xf0]  ;;  %v561_v7 = vor.u32 %v598_v2, %v558_v4  ;;  %v599_v9 = vld [vmem:[#allocation5 + $0xec] sm:$0xf]  ;;  %v566_v10 = vld [vmem:[#allocation5 + $0xf8] sm:$0xf0] }
  0x12   :  { %v565_v8 = vor.u32 %v601_v6, %v564_v5  ;;  %v540_v11 = vld [vmem:[#allocation5 + $0xc0] sm:$0xf]  ;;  %274 = vmatpush.bf16.msra.mxu0 %v557_v3  ;;  %v569_v12 = vor.u32 %v599_v9, %v566_v10  ;;  %v596_v13 = vld [vmem:[#allocation5 + $0xcc] sm:$0xf0]  ;;  %v594_v14 = vld [vmem:[#allocation5 + $0xc4] sm:$0xf] }
  0x13   :  { %v542_v15 = vld [vmem:[#allocation5 + $0xd0] sm:$0xf0]  ;;  %303 = vmatpush.bf16.msra.mxu1 %v561_v7  ;;  %v541_v16 = vor.u32 %v596_v13, %v540_v11  ;;  %v548_v18 = vld [vmem:[#allocation5 + $0xc8] sm:$0xf]  ;;  %v597_v19 = vld [vmem:[#allocation5 + $0xd4] sm:$0xf0] }
  0x14   :  { %332 = vmatpush.bf16.msra.mxu2 %v565_v8  ;;  %v545_v17 = vor.u32 %v594_v14, %v542_v15  ;;  %v595_v20 = vld [vmem:[#allocation5 + $0xcc] sm:$0xf]  ;;  %361 = vmatpush.bf16.msra.mxu3 %v569_v12  ;;  %v549_v21 = vor.u32 %v597_v19, %v548_v18  ;;  %v550_v22 = vld [vmem:[#allocation5 + $0xd8] sm:$0xf0]  ;;  %v524_v23 = vld [vmem:[#allocation5 + $0xa0] sm:$0xf] }
  0x15   :  { %v592_v24 = vld [vmem:[#allocation5 + $0xac] sm:$0xf0]  ;;  %v553_v25 = vor.u32 %v595_v20, %v550_v22  ;;  %v590_v26 = vld [vmem:[#allocation5 + $0xa4] sm:$0xf]  ;;  %v526_v27 = vld [vmem:[#allocation5 + $0xb0] sm:$0xf0] }
  0x16   :  { %v532_v28 = vld [vmem:[#allocation5 + $0xa8] sm:$0xf]  ;;  %275 = vmatpush.bf16.msra.mxu0 %v541_v16  ;;  %v525_v29 = vor.u32 %v592_v24, %v524_v23  ;;  %v593_v30 = vld [vmem:[#allocation5 + $0xb4] sm:$0xf0]  ;;  %v591_v31 = vld [vmem:[#allocation5 + $0xac] sm:$0xf]  ;;  %v529_v33 = vor.u32 %v590_v26, %v526_v27 }
  0x17   :  { %v534_v32 = vld [vmem:[#allocation5 + $0xb8] sm:$0xf0]  ;;  %304 = vmatpush.bf16.msra.mxu1 %v545_v17  ;;  %v533_v34 = vor.u32 %v593_v30, %v532_v28  ;;  %v508_v35 = vld [vmem:[#allocation5 + $0x80] sm:$0xf]  ;;  %v588_v36 = vld [vmem:[#allocation5 + $0x8c] sm:$0xf0] }
  0x18   :  { %333 = vmatpush.bf16.msra.mxu2 %v549_v21  ;;  %v586_v37 = vld [vmem:[#allocation5 + $0x84] sm:$0xf]  ;;  %362 = vmatpush.bf16.msra.mxu3 %v553_v25  ;;  %v537_v38 = vor.u32 %v591_v31, %v534_v32  ;;  %v510_v39 = vld [vmem:[#allocation5 + $0x90] sm:$0xf0]  ;;  %v516_v40 = vld [vmem:[#allocation5 + $0x88] sm:$0xf]  ;;  %v509_v44 = vor.u32 %v588_v36, %v508_v35 }
  0x19   :  { %v589_v41 = vld [vmem:[#allocation5 + $0x94] sm:$0xf0]  ;;  %v587_v42 = vld [vmem:[#allocation5 + $0x8c] sm:$0xf]  ;;  %v518_v43 = vld [vmem:[#allocation5 + $0x98] sm:$0xf0]  ;;  %v513_v45 = vor.u32 %v586_v37, %v510_v39 }
  0x1a   :  { %276 = vmatpush.bf16.msra.mxu0 %v525_v29  ;;  %v517_v46 = vor.u32 %v589_v41, %v516_v40  ;;  %v492_v47 = vld [vmem:[#allocation5 + $0x60] sm:$0xf]  ;;  %v584_v48 = vld [vmem:[#allocation5 + $0x6c] sm:$0xf0]  ;;  %v582_v49 = vld [vmem:[#allocation5 + $0x64] sm:$0xf]  ;;  %v521_v50 = vor.u32 %v587_v42, %v518_v43 }
  0x1b   :  { %305 = vmatpush.bf16.msra.mxu1 %v529_v33  ;;  %v494_v51 = vld [vmem:[#allocation5 + $0x70] sm:$0xf0]  ;;  %v500_v52 = vld [vmem:[#allocation5 + $0x68] sm:$0xf]  ;;  %v585_v53 = vld [vmem:[#allocation5 + $0x74] sm:$0xf0]  ;;  %v493_v56 = vor.u32 %v584_v48, %v492_v47 }
  0x1c   :  { %334 = vmatpush.bf16.msra.mxu2 %v533_v34  ;;  %363 = vmatpush.bf16.msra.mxu3 %v537_v38  ;;  %v583_v54 = vld [vmem:[#allocation5 + $0x6c] sm:$0xf]  ;;  %v502_v55 = vld [vmem:[#allocation5 + $0x78] sm:$0xf0]  ;;  %v497_v57 = vor.u32 %v582_v49, %v494_v51  ;;  %v501_v58 = vor.u32 %v585_v53, %v500_v52  ;;  %v476_v59 = vld [vmem:[#allocation5 + $0x40] sm:$0xf] }
  0x1d   :  { %v580_v60 = vld [vmem:[#allocation5 + $0x4c] sm:$0xf0]  ;;  %v578_v61 = vld [vmem:[#allocation5 + $0x44] sm:$0xf]  ;;  %v505_v62 = vor.u32 %v583_v54, %v502_v55  ;;  %v478_v63 = vld [vmem:[#allocation5 + $0x50] sm:$0xf0] }
  0x1e   :  { %277 = vmatpush.bf16.msra.mxu0 %v509_v44  ;;  %v484_v0 = vld [vmem:[#allocation5 + $0x48] sm:$0xf]  ;;  %v581_v1 = vld [vmem:[#allocation5 + $0x54] sm:$0xf0]  ;;  %v579_v2 = vld [vmem:[#allocation5 + $0x4c] sm:$0xf]  ;;  %v477_v4 = vor.u32 %v580_v60, %v476_v59  ;;  %v481_v5 = vor.u32 %v578_v61, %v478_v63 }
  0x1f   :  { %306 = vmatpush.bf16.msra.mxu1 %v513_v45  ;;  %v486_v3 = vld [vmem:[#allocation5 + $0x58] sm:$0xf0]  ;;  %v485_v6 = vor.u32 %v581_v1, %v484_v0  ;;  %v460_v7 = vld [vmem:[#allocation5 + $0x20] sm:$0xf]  ;;  %v576_v8 = vld [vmem:[#allocation5 + $0x2c] sm:$0xf0] }
  0x20   :  { %335 = vmatpush.bf16.msra.mxu2 %v517_v46  ;;  %364 = vmatpush.bf16.msra.mxu3 %v521_v50  ;;  %v574_v9 = vld [vmem:[#allocation5 + $0x24] sm:$0xf]  ;;  %v489_v10 = vor.u32 %v579_v2, %v486_v3  ;;  %v462_v11 = vld [vmem:[#allocation5 + $0x30] sm:$0xf0]  ;;  %v468_v12 = vld [vmem:[#allocation5 + $0x28] sm:$0xf]  ;;  %v461_v16 = vor.u32 %v576_v8, %v460_v7 }
  0x21   :  { %v577_v13 = vld [vmem:[#allocation5 + $0x34] sm:$0xf0]  ;;  %v575_v14 = vld [vmem:[#allocation5 + $0x2c] sm:$0xf]  ;;  %v470_v15 = vld [vmem:[#allocation5 + $0x38] sm:$0xf0]  ;;  %v465_v17 = vor.u32 %v574_v9, %v462_v11 }
  0x22   :  { %278 = vmatpush.bf16.msra.mxu0 %v493_v56  ;;  %v469_v18 = vor.u32 %v577_v13, %v468_v12  ;;  %v444_v19 = vld [vmem:[#allocation5] sm:$0xf]  ;;  %v572_v20 = vld [vmem:[#allocation5 + $0xc] sm:$0xf0]  ;;  %v570_v21 = vld [vmem:[#allocation5 + $0x4] sm:$0xf]  ;;  %v473_v22 = vor.u32 %v575_v14, %v470_v15 }
  0x23   :  { %307 = vmatpush.bf16.msra.mxu1 %v497_v57  ;;  %v446_v23 = vld [vmem:[#allocation5 + $0x10] sm:$0xf0]  ;;  %v452_v24 = vld [vmem:[#allocation5 + $0x8] sm:$0xf]  ;;  %v573_v25 = vld [vmem:[#allocation5 + $0x14] sm:$0xf0]  ;;  %v445_v28 = vor.u32 %v572_v20, %v444_v19 }
  0x24   :  { %336 = vmatpush.bf16.msra.mxu2 %v501_v58  ;;  %365 = vmatpush.bf16.msra.mxu3 %v505_v62  ;;  %v571_v26 = vld [vmem:[#allocation5 + $0xc] sm:$0xf]  ;;  %v454_v27 = vld [vmem:[#allocation5 + $0x18] sm:$0xf0]  ;;  %v60_v29 = vld [vmem:[#allocation2] sm:$0xff]  ;;  %v449_v31 = vor.u32 %v570_v21, %v446_v23  ;;  %v453_v32 = vor.u32 %v573_v25, %v452_v24  ;;  %s721_s0 = smov [#allocation8]  }
  0x25   :  { %v61_v30 = vld [vmem:[#allocation2 + $0x8] sm:$0xff]  ;;  %v457_v33 = vor.u32 %v571_v26, %v454_v27  ;;  %v62_v35 = vld [vmem:[#allocation2 + $0x10] sm:$0xff]  ;;  %v63_v36 = vld [vmem:[#allocation2 + $0x18] sm:$0xff]  ;;  %s426_s2 = sshll.u32 %s721_s0, 4  ;;  %s428_s5 = sshll.u32 %s799_s3, 4  ;;  %s427_s2 = int_to_ptr.vmem [resolvable:$true] %s426_s2  ;;  %s429_s5 = int_to_ptr.hbm [resolvable:$true] %s428_s5 }
  0x26   :  { %279 = vmatpush.bf16.msra.mxu0 %v477_v4  ;;  %v68_v34 = vpack.c.bf16 %v61_v30, %v60_v29  ;;  %v69_v37 = vpack.c.bf16 %v63_v36, %v62_v35  ;;  %v64_v38 = vld [vmem:[#allocation2 + $0x20] sm:$0xff]  ;;  %v65_v39 = vld [vmem:[#allocation2 + $0x28] sm:$0xff]  ;;  %v66_v41 = vld [vmem:[#allocation2 + $0x30] sm:$0xff]  ;;  %s722_s6 = smov 512   ;;  %s723_s7 = smov 32  }
  0x27   :  { %308 = vmatpush.bf16.msra.mxu1 %v481_v5  ;;  %v70_v40 = vpack.c.bf16 %v65_v39, %v64_v38  ;;  %v67_v42 = vld [vmem:[#allocation2 + $0x38] sm:$0xff]  ;;  %v104_v44 = vld [vmem:[#allocation7] sm:$0xf] }
  0x28   :  { %337 = vmatpush.bf16.msra.mxu2 %v485_v6  ;;  %366 = vmatpush.bf16.msra.mxu3 %v489_v10  ;;  %v71_v43 = vpack.c.bf16 %v67_v42, %v66_v41  ;;  %v753_v45 = vperm.slane %v104_v44, 0  ;;  %v755_v46 = vperm.slane %v104_v44, 1  ;;  %v759_v51 = vperm.slane %v104_v44, 2 }
  0x29   :  { %v761_v52 = vperm.slane %v104_v44, 3 }
  0x2a   :  { %280 = vmatpush.bf16.msra.mxu0 %v461_v16 }
  0x2b   :  { %309 = vmatpush.bf16.msra.mxu1 %v465_v17 }
  0x2c   :  { %338 = vmatpush.bf16.msra.mxu2 %v469_v18  ;;  %367 = vmatpush.bf16.msra.mxu3 %v473_v22 }
  0x2e   :  { %281 = vmatpush.bf16.msra.mxu0 %v445_v28 }
  0x2f   :  { %310 = vmatpush.bf16.msra.mxu1 %v449_v31 }
  0x30   :  { %339 = vmatpush.bf16.msra.mxu2 %v453_v32  ;;  %368 = vmatpush.bf16.msra.mxu3 %v457_v33 }
  0x31   :  { %282 = vmatmul.bf16.vlgmr.msra.gmra.mxu0 %v68_v34 }
  0x32   :  { %311 = vmatmul.bf16.vlgmr.msra.gmra.mxu1 %v68_v34 }
  0x33   :  { %340 = vmatmul.bf16.vlgmr.msra.gmra.mxu2 %v68_v34  ;;  %369 = vmatmul.bf16.vlgmr.msra.gmra.mxu3 %v68_v34 }
  0x41   :  { %287 = vmatmul.bf16.gmra.mxu0 %v69_v37 }
  0x42   :  { %316 = vmatmul.bf16.gmra.mxu1 %v69_v37 }
  0x43   :  { %345 = vmatmul.bf16.gmra.mxu2 %v69_v37  ;;  %374 = vmatmul.bf16.gmra.mxu3 %v69_v37 }
  0x51   :  { %292 = vmatmul.bf16.gmra.mxu0 %v70_v40 }
  0x52   :  { %321 = vmatmul.bf16.gmra.mxu1 %v70_v40 }
  0x53   :  { %350 = vmatmul.bf16.gmra.mxu2 %v70_v40  ;;  %379 = vmatmul.bf16.gmra.mxu3 %v70_v40 }
  0x61   :  { %297 = vmatmul.bf16.gmra.mxu0 %v71_v43 }
  0x62   :  { %326 = vmatmul.bf16.gmra.mxu1 %v71_v43 }
  0x63   :  { %355 = vmatmul.bf16.gmra.mxu2 %v71_v43  ;;  %384 = vmatmul.bf16.gmra.mxu3 %v71_v43 }
  0xae   :  { %v283_v47 = vpop.f32.mrf.mxu0 }
  0xaf   :  { %v284_v48 = vadd.f32 %v283_v47, %v753_v45  ;;  %v312_v49 = vpop.f32.mrf.mxu1 }
  0xb0   :  { %v313_v50 = vadd.f32 %v312_v49, %v755_v46 }
  0xb1   :  { %390 = vst [vmem:[#allocation8] sm:$0xff] %v284_v48 }
  0xb2   :  { %391 = vst [vmem:[#allocation8 + $0x8] sm:$0xff] %v313_v50 }
  0xb6   :  { %v341_v53 = vpop.f32.mrf.mxu2  ;;  %v370_v55 = vpop.f32.mrf.mxu3 }
  0xb7   :  { %v342_v54 = vadd.f32 %v341_v53, %v759_v51  ;;  %v285_v56 = vpop.f32.mrf.mxu0  ;;  %v371_v57 = vadd.f32 %v370_v55, %v761_v52  ;;  %v314_v59 = vpop.f32.mrf.mxu1 }
  0xb8   :  { %v286_v58 = vadd.f32 %v285_v56, %v753_v45  ;;  %v315_v60 = vadd.f32 %v314_v59, %v755_v46 }
  0xb9   :  { %392 = vst [vmem:[#allocation8 + $0x10] sm:$0xff] %v342_v54 }
  0xba   :  { %393 = vst [vmem:[#allocation8 + $0x18] sm:$0xff] %v371_v57 }
  0xbb   :  { %394 = vst [vmem:[#allocation8 + $0x20] sm:$0xff] %v286_v58 }
  0xbc   :  { %395 = vst [vmem:[#allocation8 + $0x28] sm:$0xff] %v315_v60 }
  0xbe   :  { %v343_v61 = vpop.f32.mrf.mxu2  ;;  %v372_v63 = vpop.f32.mrf.mxu3 }
  0xbf   :  { %v344_v62 = vadd.f32 %v343_v61, %v759_v51  ;;  %v288_v0 = vpop.f32.mrf.mxu0  ;;  %v373_v1 = vadd.f32 %v372_v63, %v761_v52  ;;  %v317_v3 = vpop.f32.mrf.mxu1 }
  0xc0   :  { %v289_v2 = vadd.f32 %v288_v0, %v753_v45  ;;  %v318_v4 = vadd.f32 %v317_v3, %v755_v46 }
  0xc1   :  { %396 = vst [vmem:[#allocation8 + $0x30] sm:$0xff] %v344_v62 }
  0xc2   :  { %397 = vst [vmem:[#allocation8 + $0x38] sm:$0xff] %v373_v1 }
  0xc3   :  { %398 = vst [vmem:[#allocation8 + $0x40] sm:$0xff] %v289_v2 }
  0xc4   :  { %399 = vst [vmem:[#allocation8 + $0x48] sm:$0xff] %v318_v4 }
  0xc6   :  { %v346_v5 = vpop.f32.mrf.mxu2  ;;  %v375_v7 = vpop.f32.mrf.mxu3 }
  0xc7   :  { %v347_v6 = vadd.f32 %v346_v5, %v759_v51  ;;  %v290_v8 = vpop.f32.mrf.mxu0  ;;  %v376_v9 = vadd.f32 %v375_v7, %v761_v52  ;;  %v319_v11 = vpop.f32.mrf.mxu1 }
  0xc8   :  { %v291_v10 = vadd.f32 %v290_v8, %v753_v45  ;;  %v320_v12 = vadd.f32 %v319_v11, %v755_v46 }
  0xc9   :  { %400 = vst [vmem:[#allocation8 + $0x50] sm:$0xff] %v347_v6 }
  0xca   :  { %401 = vst [vmem:[#allocation8 + $0x58] sm:$0xff] %v376_v9 }
  0xcb   :  { %402 = vst [vmem:[#allocation8 + $0x60] sm:$0xff] %v291_v10 }
  0xcc   :  { %403 = vst [vmem:[#allocation8 + $0x68] sm:$0xff] %v320_v12 }
  0xce   :  { %v348_v13 = vpop.f32.mrf.mxu2  ;;  %v377_v15 = vpop.f32.mrf.mxu3 }
  0xcf   :  { %v349_v14 = vadd.f32 %v348_v13, %v759_v51  ;;  %v293_v16 = vpop.f32.mrf.mxu0  ;;  %v378_v17 = vadd.f32 %v377_v15, %v761_v52  ;;  %v322_v19 = vpop.f32.mrf.mxu1 }
  0xd0   :  { %v294_v18 = vadd.f32 %v293_v16, %v753_v45  ;;  %v323_v20 = vadd.f32 %v322_v19, %v755_v46 }
  0xd1   :  { %404 = vst [vmem:[#allocation8 + $0x70] sm:$0xff] %v349_v14 }
  0xd2   :  { %405 = vst [vmem:[#allocation8 + $0x78] sm:$0xff] %v378_v17 }
  0xd3   :  { %406 = vst [vmem:[#allocation8 + $0x80] sm:$0xff] %v294_v18 }
  0xd4   :  { %407 = vst [vmem:[#allocation8 + $0x88] sm:$0xff] %v323_v20 }
  0xd6   :  { %v351_v21 = vpop.f32.mrf.mxu2  ;;  %v380_v23 = vpop.f32.mrf.mxu3 }
  0xd7   :  { %v352_v22 = vadd.f32 %v351_v21, %v759_v51  ;;  %v295_v24 = vpop.f32.mrf.mxu0  ;;  %v381_v25 = vadd.f32 %v380_v23, %v761_v52  ;;  %v324_v27 = vpop.f32.mrf.mxu1 }
  0xd8   :  { %v296_v26 = vadd.f32 %v295_v24, %v753_v45  ;;  %v325_v28 = vadd.f32 %v324_v27, %v755_v46 }
  0xd9   :  { %408 = vst [vmem:[#allocation8 + $0x90] sm:$0xff] %v352_v22 }
  0xda   :  { %409 = vst [vmem:[#allocation8 + $0x98] sm:$0xff] %v381_v25 }
  0xdb   :  { %410 = vst [vmem:[#allocation8 + $0xa0] sm:$0xff] %v296_v26 }
  0xdc   :  { %411 = vst [vmem:[#allocation8 + $0xa8] sm:$0xff] %v325_v28 }
  0xde   :  { %v353_v29 = vpop.f32.mrf.mxu2  ;;  %v382_v31 = vpop.f32.mrf.mxu3 }
  0xdf   :  { %v354_v30 = vadd.f32 %v353_v29, %v759_v51  ;;  %v298_v32 = vpop.f32.mrf.mxu0  ;;  %v383_v33 = vadd.f32 %v382_v31, %v761_v52  ;;  %v327_v35 = vpop.f32.mrf.mxu1 }
  0xe0   :  { %v299_v34 = vadd.f32 %v298_v32, %v753_v45  ;;  %v328_v36 = vadd.f32 %v327_v35, %v755_v46 }
  0xe1   :  { %412 = vst [vmem:[#allocation8 + $0xb0] sm:$0xff] %v354_v30 }
  0xe2   :  { %413 = vst [vmem:[#allocation8 + $0xb8] sm:$0xff] %v383_v33 }
  0xe3   :  { %414 = vst [vmem:[#allocation8 + $0xc0] sm:$0xff] %v299_v34 }
  0xe4   :  { %415 = vst [vmem:[#allocation8 + $0xc8] sm:$0xff] %v328_v36 }
  0xe6   :  { %v356_v37 = vpop.f32.mrf.mxu2  ;;  %v385_v39 = vpop.f32.mrf.mxu3 }
  0xe7   :  { %v357_v38 = vadd.f32 %v356_v37, %v759_v51  ;;  %v300_v40 = vpop.f32.mrf.mxu0  ;;  %v386_v41 = vadd.f32 %v385_v39, %v761_v52  ;;  %v329_v43 = vpop.f32.mrf.mxu1 }
  0xe8   :  { %v301_v42 = vadd.f32 %v300_v40, %v753_v45  ;;  %v330_v44 = vadd.f32 %v329_v43, %v755_v46 }
  0xe9   :  { %416 = vst [vmem:[#allocation8 + $0xd0] sm:$0xff] %v357_v38 }
  0xea   :  { %417 = vst [vmem:[#allocation8 + $0xd8] sm:$0xff] %v386_v41 }
  0xeb   :  { %418 = vst [vmem:[#allocation8 + $0xe0] sm:$0xff] %v301_v42 }
  0xec   :  { %419 = vst [vmem:[#allocation8 + $0xe8] sm:$0xff] %v330_v44 }
  0xee   :  { %v358_v47 = vpop.f32.mrf.mxu2  ;;  %v387_v49 = vpop.f32.mrf.mxu3 }
  0xef   :  { %v359_v48 = vadd.f32 %v358_v47, %v759_v51  ;;  %v388_v45 = vadd.f32 %v387_v49, %v761_v52 }
  0xf1   :  { %420 = vst [vmem:[#allocation8 + $0xf0] sm:$0xff] %v359_v48 }
  0xf2   :  { %421 = vst [vmem:[#allocation8 + $0xf8] sm:$0xff] %v388_v45 }
  0xf3   :  { %434 = dma.vmem_to_hbm [thread:$0]  %s427_s2, 4096, %s429_s5, [#allocation4], %s722_s6, %s722_s6, %s723_s7  }
  0xf4   :  { %712 = dma.done.wait [#allocation4], 4096  }
  0xf5   :  { %713 = vsyncadd [#allocation4], 4294963200 }
  0xf6   :  { %439 = vsyncpa [#allocation3], 1 }
  0xf7   :  { %440 = vsyncpa [#allocation6], 1 }
  0xf8   :  { %441 = vsyncpa [#allocation4], 1 }

</bundles_post_ra>
